<compile_context>
chip_gen: v5e
topology: v5e:2x2
jax: 0.10.0
libtpu: 0.0.40
codegen_flags: <defaults>
</compile_context>

<pallas_src>
import math

import jax
import jax.numpy as jnp
from jax.experimental import pallas as pl
from jax.experimental.pallas import tpu as pltpu

_TARGET_BLOCK_BYTES = 4 * 1024 * 1024   # ~4 MiB per operand block (v6e/v7x sweet spot)
_VMEM_LIMIT_BYTES = 32 * 1024 * 1024    # covers 6 x 4 MiB double-buffered blocks
_MIN_SPLIT_BYTES = 1 * 1024 * 1024      # only chase v7x 2-TC splits above this


def _mul_kernel(a_ref, b_ref, o_ref):
    # Dtype promotion happens in-register (jnp rules), never in HBM.  b_ref may
    # be a resident (1, 1) scalar block; jnp broadcasting handles it.
    o_ref[...] = (a_ref[...] * b_ref[...]).astype(o_ref.dtype)


def _cdiv(a, b):
    return -(-a // b)


def _round_up(a, m):
    return _cdiv(a, m) * m


def _even_tile(extent, tile, align):
    """Best-effort shrink of `tile` (to a multiple of `align`) so cdiv(extent, tile)
    is even: an even program count on a 'parallel' grid axis keeps both v7x
    TensorCores busy and balanced."""
    nb = _cdiv(extent, tile)
    if nb % 2 == 0:
        return tile
    for target in range(nb + 1, nb + 9):
        cand = max(align, _round_up(_cdiv(extent, target), align))
        if cand < extent and _cdiv(extent, cand) % 2 == 0:
            return cand
    return tile


def multiplication_strategy(x, y):
    """Elementwise x * y (torch broadcasting semantics) via a Pallas TPU kernel."""
    x = jnp.asarray(x)
    y = jnp.asarray(y)
    out_shape = jnp.broadcast_shapes(x.shape, y.shape)
    out_dtype = jnp.result_type(x, y)
    total = math.prod(out_shape) if out_shape else 1
    if total == 0:
        return jnp.zeros(out_shape, out_dtype)

    # ---- resolve broadcasting without materializing where possible ----------
    # A size-1 operand stays a (1, 1) block that is resident in VMEM (constant
    # block index -> fetched once), instead of jnp.broadcast_to writing an
    # expanded copy to HBM.
    small = None
    a_full = None
    if x.shape != out_shape or y.shape != out_shape:
        if y.size == 1 and x.size != 1:
            a_full, small = x, y
        elif x.size == 1 and y.size != 1:
            a_full, small = y, x
        else:
            # TODO(synk): express per-axis broadcasts (e.g. (1,C,1,1) scales) via
            # BlockSpec index_maps instead of materializing, if non-scalar
            # broadcasting ever becomes a hot path.
            x = jnp.broadcast_to(x, out_shape)
            y = jnp.broadcast_to(y, out_shape)

    # ---- 2D presentation with NO pad and NO output slice --------------------
    ndim = len(out_shape)
    if ndim >= 1 and out_shape[-1] % 128 == 0:
        # Collapse leading dims only: layout-preserving (usually a bitcast) and
        # already lane-dense (>= 128 lanes, unmasked vst).
        cols = out_shape[-1]
        rows = total // cols
    elif total % 128 == 0:
        # Exact lane-dense flatten; divides by construction, so no padding.
        cols = 128
        for cand in (1024, 512, 256):
            if total % cand == 0:
                cols = cand
                break
        rows = total // cols
    elif ndim >= 1:
        # Unaligned element count: keep the natural last dim and let Pallas mask
        # the boundary blocks instead of adding a pad + slice HBM pass.
        # TODO(synk): stores are lane-masked when out_shape[-1] < 128.
        cols = out_shape[-1]
        rows = total // cols
    else:
        rows, cols = 1, 1

    if a_full is not None:
        a2 = a_full.reshape(rows, cols)
        b2 = small.reshape(1, 1)
        tiled = (a2,)
    else:
        a2 = x.reshape(rows, cols)
        b2 = y.reshape(rows, cols)
        tiled = (a2, b2)

    itemsize_out = jnp.dtype(out_dtype).itemsize
    itemsize_max = max([arr.dtype.itemsize for arr in tiled] + [itemsize_out])
    itemsize_min = min([arr.dtype.itemsize for arr in tiled] + [itemsize_out])
    # Sublane packing of the narrowest streamed dtype: 8 (32-bit), 16 (bf16),
    # 32 (int8/fp8) -> no sub-tile relayout, stores stay full-width.
    sub = max(8, 32 // itemsize_min)

    # Column tile: as wide as the ~4 MiB budget allows (multiple of 128 so a
    # partial boundary block stays legal), capped at the full extent.
    max_cols = max(128, (_TARGET_BLOCK_BYTES // (sub * itemsize_max)) // 128 * 128)
    tile_c = cols if cols <= max_cols else max_cols

    rows_budget = max(sub, _TARGET_BLOCK_BYTES // (tile_c * itemsize_max))
    if rows_budget >= rows:
        tile_r = rows
    else:
        tile_r = max(sub, (rows_budget // sub) * sub)

    # v7x shards 'parallel' grid axes over its two TensorCores: once the work
    # exceeds ~1 MiB, make the program count even (and at least 2).
    if total * itemsize_max > _MIN_SPLIT_BYTES:
        if (_cdiv(rows, tile_r) * _cdiv(cols, tile_c)) % 2 == 1:
            new_tile_r = _even_tile(rows, tile_r, sub)
            if _cdiv(rows, new_tile_r) % 2 == 0:
                tile_r = new_tile_r
            else:
                tile_c = _even_tile(cols, tile_c, 128)

    grid = (_cdiv(rows, tile_r), _cdiv(cols, tile_c))

    full_spec = pl.BlockSpec((tile_r, tile_c), lambda i, j: (i, j))
    if a_full is not None:
        in_specs = [full_spec, pl.BlockSpec((1, 1), lambda i, j: (0, 0))]
    else:
        in_specs = [full_spec, full_spec]

    bytes_accessed = (x.size * x.dtype.itemsize
                      + y.size * y.dtype.itemsize
                      + total * itemsize_out)

    out2 = pl.pallas_call(
        _mul_kernel,
        out_shape=jax.ShapeDtypeStruct((rows, cols), out_dtype),
        grid=grid,
        in_specs=in_specs,
        out_specs=full_spec,
        compiler_params=pltpu.CompilerParams(
            dimension_semantics=("parallel", "parallel"),
            # 6 x 4 MiB double-buffered blocks ~= 24 MiB: within v6e/v7x scoped
            # defaults; set explicitly so v5e's 16 MiB default does not fail.
            vmem_limit_bytes=_VMEM_LIMIT_BYTES,
        ),
        cost_estimate=pl.CostEstimate(
            flops=total, transcendentals=0, bytes_accessed=bytes_accessed),
    )(a2, b2)

    return out2.reshape(out_shape)


if __name__ == "__main__":
    key = jax.random.PRNGKey(0)
    kx, ky, kx2, ky2, kx3 = jax.random.split(key, 5)

    # Small NCHW-like shapes consistent with typical usage of this module.
    x = jax.random.normal(kx, (2, 4, 16, 16), dtype=jnp.float32)
    y = jax.random.normal(ky, (2, 4, 16, 16), dtype=jnp.float32)
    out = multiplication_strategy(x, y)
    jax.block_until_ready(out)
    assert out.shape == (2, 4, 16, 16)
    assert jnp.allclose(out, x * y, atol=1e-6, rtol=1e-6)

    # >1 MiB tensor: exercises the even multi-program split (v7x 2-TC path).
    x2 = jax.random.normal(kx2, (8, 8, 64, 128), dtype=jnp.float32)
    y2 = jax.random.normal(ky2, (8, 8, 64, 128), dtype=jnp.float32)
    out2 = multiplication_strategy(x2, y2)
    jax.block_until_ready(out2)
    assert jnp.allclose(out2, x2 * y2, atol=1e-6, rtol=1e-6)

    # Scalar broadcast: resident (1, 1) block, nothing materialized in HBM.
    out3 = multiplication_strategy(x, jnp.float32(2.5))
    jax.block_until_ready(out3)
    assert jnp.allclose(out3, x * 2.5, atol=1e-6, rtol=1e-6)

    # Lane-unaligned element count: masked boundary, no pad / no output slice.
    x3 = jax.random.normal(kx3, (3, 5, 7), dtype=jnp.float32)
    out4 = multiplication_strategy(x3, x3)
    jax.block_until_ready(out4)
    assert jnp.allclose(out4, x3 * x3, atol=1e-6, rtol=1e-6)

    print("KERNEL_OK")
</pallas_src>

<mosaic_0001>
module attributes {stable_mosaic.version = 11 : i64} {
  func.func @_mul_kernel(%arg0: i32, %arg1: i32, %arg2: memref<2x1024xf32, #tpu.memory_space<vmem>>, %arg3: memref<2x1024xf32, #tpu.memory_space<vmem>>, %arg4: memref<2x1024xf32, #tpu.memory_space<vmem>>) attributes {dimension_semantics = [#tpu.dimension_semantics<parallel>, #tpu.dimension_semantics<parallel>], iteration_bounds = array<i64: 1, 1>, scalar_prefetch = 0 : i64, scratch_operands = 0 : i64, tpu.core_type = #tpu.core_type<tc>, window_params = [{transform_indices = @transform_0, window_bounds = array<i64: 2, 1024>}, {transform_indices = @transform_1, window_bounds = array<i64: 2, 1024>}, {transform_indices = @transform_2, window_bounds = array<i64: 2, 1024>}]} {
    %c0 = arith.constant 0 : index
    %c0_0 = arith.constant 0 : index
    %0 = vector.load %arg2[%c0, %c0_0] : memref<2x1024xf32, #tpu.memory_space<vmem>>, vector<2x1024xf32>
    %c0_1 = arith.constant 0 : index
    %c0_2 = arith.constant 0 : index
    %1 = vector.load %arg3[%c0_1, %c0_2] : memref<2x1024xf32, #tpu.memory_space<vmem>>, vector<2x1024xf32>
    %2 = arith.mulf %0, %1 : vector<2x1024xf32>
    %c0_3 = arith.constant 0 : index
    %c0_4 = arith.constant 0 : index
    %3 = vector.load %arg4[%c0_3, %c0_4] : memref<2x1024xf32, #tpu.memory_space<vmem>>, vector<2x1024xf32>
    tpu.vector_store %arg4[%c0_3, %c0_4], %2 {strides = array<i32>} : memref<2x1024xf32, #tpu.memory_space<vmem>>, vector<2x1024xf32>,
    return
  }
  func.func @transform_0(%arg0: i32, %arg1: i32) -> (i32, i32) {
    %c0_i32 = arith.constant 0 : i32
    return %arg0, %arg1 : i32, i32
  }
  func.func @transform_1(%arg0: i32, %arg1: i32) -> (i32, i32) {
    %c0_i32 = arith.constant 0 : i32
    return %arg0, %arg1 : i32, i32
  }
  func.func @transform_2(%arg0: i32, %arg1: i32) -> (i32, i32) {
    %c0_i32 = arith.constant 0 : i32
    return %arg0, %arg1 : i32, i32
  }
}

</mosaic_0001>

<bundles_post_ra>
// kernel: tpu_custom_call.1
= control target key start
LH: loop header
LB: loop body
LE: loop exit
PB: predicated region body
PF: predicated region fallthrough
CT: control target
= control target key end

     0   :  { %7 = vsyncpa [#allocation3], 0  ;;  %s174_s0 = inlined_call_operand.hbm [shape: f32[2,1024], index: 0, kind: input, shape index: {}]   ;;  %s175_s1 = inlined_call_operand.hbm [shape: f32[2,1024], index: 1, kind: input, shape index: {}]   ;;  %s176_s2 = inlined_call_operand.hbm [shape: f32[2,1024], index: 2, kind: output, shape index: {}]  }
   0x1   :  { %8 = vsyncpa [#allocation6], 0 }
   0x2   :  { %9 = vsyncpa [#allocation4], 0  ;;  %s15_s11 = sshll.u32 %s174_s0, 4  ;;  %s147_s12 = smov [#allocation2]   ;;  %s16_s11 = int_to_ptr.hbm [resolvable:$true] %s15_s11 }
   0x3   :  { %s17_s13 = sshll.u32 %s147_s12, 4  ;;  %s26_s16 = sshll.u32 %s175_s1, 4  ;;  %s18_s13 = int_to_ptr.vmem [resolvable:$true] %s17_s13  ;;  %s27_s16 = int_to_ptr.hbm [resolvable:$true] %s26_s16 }
   0x4   :  { %20 = dma.hbm_to_vmem [thread:$0]  %s16_s11, 256, %s18_s13, [#allocation3]  }
   0x5   :  { %s148_s17 = smov [#allocation5]  }
   0x6   :  { %s28_s18 = sshll.u32 %s148_s17, 4  ;;  %s29_s18 = int_to_ptr.vmem [resolvable:$true] %s28_s18 }
   0x7   :  { %31 = dma.hbm_to_vmem [thread:$0]  %s27_s16, 256, %s29_s18, [#allocation6]  }
   0x8   :  { %141 = dma.done.wait [#allocation3], 256  }
   0x9   :  { %142 = vsyncadd [#allocation3], 4294967040 }
   0xa   :  { %143 = dma.done.wait [#allocation6], 256  }
   0xb   :  { %144 = vsyncadd [#allocation6], 4294967040  ;;  %s149_s19 = smov [#allocation7]   ;;  %s55_s22 = sshll.u32 %s176_s2, 4  ;;  %v40_v0 = vld [vmem:[#allocation2] sm:$0xff]  ;;  %v42_v1 = vld [vmem:[#allocation5] sm:$0xff]  ;;  %s56_s22 = int_to_ptr.hbm [resolvable:$true] %s55_s22 }
   0xc   :  { %s53_s0 = sshll.u32 %s149_s19, 4  ;;  %v41_v2 = vld [vmem:[#allocation2 + $0x8] sm:$0xff]  ;;  %v44_v3 = vmul.f32 %v42_v1, %v40_v0  ;;  %v43_v4 = vld [vmem:[#allocation5 + $0x8] sm:$0xff]  ;;  %s54_s0 = int_to_ptr.vmem [resolvable:$true] %s53_s0 }
   0xd   :  { %v45_v5 = vmul.f32 %v43_v4, %v41_v2 }
   0xe   :  { %46 = vst [vmem:[#allocation7] sm:$0xff] %v44_v3 }
   0xf   :  { %47 = vst [vmem:[#allocation7 + $0x8] sm:$0xff] %v45_v5 }
  0x10   :  { %58 = dma.vmem_to_hbm [thread:$0]  %s54_s0, 256, %s56_s22, [#allocation4]  }
  0x11   :  { %145 = dma.done.wait [#allocation4], 256  }
  0x12   :  { %146 = vsyncadd [#allocation4], 4294967040 }
  0x13   :  { %63 = vsyncpa [#allocation3], 1 }
  0x14   :  { %64 = vsyncpa [#allocation6], 1 }
  0x15   :  { %65 = vsyncpa [#allocation4], 1 }

</bundles_post_ra>
